<compile_context>
chip_gen: v6e
topology: v6e:2x2x1
jax: 0.10.0
libtpu: 0.0.40
codegen_flags: <defaults>
</compile_context>

<pallas_src>
import functools
import math

import jax
import jax.numpy as jnp
from jax.experimental import pallas as pl
from jax.experimental.pallas import tpu as pltpu


def _round_up(x, m):
    return -(-x // m) * m


def _vmem_capacity_bytes():
    """Best-effort VMEM capacity query with a conservative (v7x) fallback."""
    try:
        info = pltpu.get_tpu_info()
        for name in ("vmem_capacity_bytes", "vmem_bytes", "vmem_size_bytes"):
            v = getattr(info, name, None)
            if v:
                return int(v)
    except Exception:
        pass
    return 64 * 1024 * 1024


def _choose_tiles(B, N):
    """Pick (Bt, B_pad, T, N_pad, vmem_limit) minimising quadratic padding."""
    capacity = _vmem_capacity_bytes()
    if capacity >= 100 * 1024 * 1024:          # v5e / v6e: 128 MiB VMEM
        vmem_limit = 80 * 1024 * 1024
        budget = 40 * 1024 * 1024
    else:                                       # v7x: 64 MiB VMEM
        vmem_limit = 40 * 1024 * 1024
        budget = 18 * 1024 * 1024

    # Live per-step (Bt, T, T) f32 intermediates (diff, d2, kmat + slack).
    def fits(bt, t):
        return 4 * bt * t * t * 4 <= budget

    # N tile: padded rows cost quadratically -> minimise N_pad first; among
    # ties prefer the larger tile (fewer grid steps, deeper MXU contraction).
    best_t = None
    for t in (512, 256, 128):
        if not fits(1, t):
            continue
        key = (_round_up(N, t), -t)
        if best_t is None or key < best_t[0]:
            best_t = (key, t)
    T = best_t[1]
    N_pad = _round_up(N, T)

    # Batch tile: minimise padded batches, keep >= 2 parallel grid steps when
    # possible (v7x has two TensorCores), then prefer larger Bt (per-step
    # overhead amortisation).
    best_bt = None
    for bt in range(1, min(B, 8) + 1):
        if not fits(bt, T):
            continue
        b_pad = _round_up(B, bt)
        par = (b_pad // bt) * (N_pad // T)
        key = (b_pad - B, 0 if par >= 2 else 1, -bt)
        if best_bt is None or key < best_bt[0]:
            best_bt = (key, bt)
    Bt = best_bt[1]
    B_pad = _round_up(B, Bt)
    return Bt, B_pad, T, N_pad, vmem_limit


def _lddmm_kernel(p_i_ref, q_i_ref, p_j_ref, q_j_ref,
                  pdot_ref, qdot_ref, acc_ref,
                  *, inv_sigma2, dim, use_bf16):
    # Blocks (lane dim = Ti / Tj, multiples of 128):
    #   p_i_ref, q_i_ref : (Bt, D, Ti)   i-side momentum / points
    #   p_j_ref, q_j_ref : (Bt, D, Tj)   j-side momentum / points
    #   acc_ref          : (Bt, D + D*D, Ti) f32 accumulator:
    #     row d             = sum_j p_j[d]          * K_ji   (-> qdot, row_w)
    #     row D + d*D + e   = sum_j p_j[d]*q_j[e]   * K_ji   (-> wq)
    j = pl.program_id(2)

    @pl.when(j == 0)
    def _init():
        acc_ref[...] = jnp.zeros_like(acc_ref)

    q_i = q_i_ref[...].astype(jnp.float32)                   # (Bt, D, Ti)
    q_j = q_j_ref[...].astype(jnp.float32)                   # (Bt, D, Tj)
    p_j = p_j_ref[...].astype(jnp.float32)                   # (Bt, D, Tj)

    # Fold the Gaussian scale into q (O(D*T)) so kmat = exp(-d2) needs no
    # extra (T, T) multiply.
    scale = math.sqrt(0.5 * inv_sigma2)
    q_i_s = q_i * scale
    q_j_s = q_j * scale

    # Pairwise scaled squared distances, direct-difference form (d2 >= 0 and
    # d2 == 0 exactly on the diagonal).  Built on the VPU (K = D is tiny).
    d2 = None
    for d in range(dim):
        diff = q_j_s[:, d, :, None] - q_i_s[:, d, None, :]   # (Bt, Tj, Ti)
        sq = diff * diff
        d2 = sq if d2 is None else d2 + sq

    kmat = jnp.exp(-d2)                                       # exp(0) == 1 exactly
    if use_bf16:
        kmat = kmat.astype(jnp.bfloat16)

    # Augmented LHS (D + D*D rows): ONE long-K MXU matmul against kmat gives
    # both the qdot rows and all p_j[d]*q_j[e]-weighted sums.
    rows = [p_j]
    for d in range(dim):
        rows.append(p_j[:, d:d + 1, :] * q_j)                 # (Bt, D, Tj)
    lhs = jnp.concatenate(rows, axis=1)                       # (Bt, D+D*D, Tj)
    if use_bf16:
        lhs = lhs.astype(jnp.bfloat16)

    acc_ref[...] += jnp.einsum('brj,bji->bri', lhs, kmat,
                               preferred_element_type=jnp.float32)

    @pl.when(j == pl.num_programs(2) - 1)
    def _finalize():
        acc = acc_ref[...]                                    # (Bt, D+D*D, Ti)
        p_i = p_i_ref[...].astype(jnp.float32)                # (Bt, D, Ti)

        qdot_ref[...] = acc[:, :dim, :].astype(qdot_ref.dtype)

        # Subtract the diagonal (j == i) MXU contribution before forming pdot:
        # it is mathematically zero (q_i - q_i) but its bf16-rounded pieces do
        # not cancel between row_w*q_i and wq.  K_ii == 1 exactly and the bf16
        # rounding below matches the LHS cast bit-for-bit, so the subtraction
        # restores exact (f32-level) cancellation.
        if use_bf16:
            def rnd(x):
                return x.astype(jnp.bfloat16).astype(jnp.float32)
        else:
            def rnd(x):
                return x

        row_w = None                                          # (Bt, 1, Ti)
        wq = None                                             # (Bt, D, Ti)
        for d in range(dim):
            p_d = p_i[:, d:d + 1, :]                          # (Bt, 1, Ti)
            acc_p_d = acc[:, d:d + 1, :] - rnd(p_d)
            term_w = p_d * acc_p_d
            row_w = term_w if row_w is None else row_w + term_w
            acc_pq_d = acc[:, dim + d * dim: dim + (d + 1) * dim, :] - rnd(p_d * q_i)
            term_q = p_d * acc_pq_d
            wq = term_q if wq is None else wq + term_q

        pdot_ref[...] = (inv_sigma2 * (row_w * q_i - wq)).astype(pdot_ref.dtype)


def lddmm_hamilton_forward(mom, control_points, *, sigma=0.1,
                           use_bf16_matmul=True):
    """forward(t, (mom, control_points)) in 'shooting' mode.

    Returns (p_dot, q_dot) = (-dH/dq, dH/dp), each of shape (B, N, D),
    matching the PyTorch module's `return (-grad_control, grad_mom)`.
    """
    assert mom.shape == control_points.shape
    B, N, D = mom.shape
    inv_sigma2 = 1.0 / (sigma * sigma)
    out_dtype = mom.dtype

    Bt, B_pad, T, N_pad, vmem_limit = _choose_tiles(B, N)

    p, q = mom, control_points
    if B_pad != B or N_pad != N:
        # Zero momentum padding guarantees padded points contribute nothing to
        # real rows (all their LHS rows vanish).
        p = jnp.pad(p, ((0, B_pad - B), (0, N_pad - N), (0, 0)))
        q = jnp.pad(q, ((0, B_pad - B), (0, N_pad - N), (0, 0)))
    pT = jnp.transpose(p, (0, 2, 1))                          # (B_pad, D, N_pad)
    qT = jnp.transpose(q, (0, 2, 1))                          # (B_pad, D, N_pad)

    grid = (B_pad // Bt, N_pad // T, N_pad // T)              # (batch, i, j)

    i_spec = pl.BlockSpec((Bt, D, T), lambda b, i, j: (b, 0, i))
    j_spec = pl.BlockSpec((Bt, D, T), lambda b, i, j: (b, 0, j))
    out_spec = pl.BlockSpec((Bt, D, T), lambda b, i, j: (b, 0, i))

    kernel = functools.partial(_lddmm_kernel, inv_sigma2=inv_sigma2, dim=D,
                               use_bf16=use_bf16_matmul)

    pdot_T, qdot_T = pl.pallas_call(
        kernel,
        out_shape=(
            jax.ShapeDtypeStruct((B_pad, D, N_pad), out_dtype),  # -dH/dq
            jax.ShapeDtypeStruct((B_pad, D, N_pad), out_dtype),  # dH/dp
        ),
        grid_spec=pltpu.PrefetchScalarGridSpec(
            num_scalar_prefetch=0,
            grid=grid,
            in_specs=[i_spec, i_spec, j_spec, j_spec],
            out_specs=(out_spec, out_spec),
            scratch_shapes=[
                pltpu.VMEM((Bt, D + D * D, T), jnp.float32),  # single accumulator
            ],
        ),
        compiler_params=pltpu.CompilerParams(
            dimension_semantics=("parallel", "parallel", "arbitrary"),
            vmem_limit_bytes=vmem_limit,
        ),
    )(pT, qT, pT, qT)

    pdot = jnp.transpose(pdot_T, (0, 2, 1))[:B, :N, :]
    qdot = jnp.transpose(qdot_T, (0, 2, 1))[:B, :N, :]
    return pdot, qdot


def _reference(mom, control_points, sigma=0.1):
    # Pure-JAX (f32) reference for validation.
    inv_sigma2 = 1.0 / (sigma * sigma)
    q = control_points.astype(jnp.float32)
    p = mom.astype(jnp.float32)
    diff = q[:, :, None, :] - q[:, None, :, :]           # (B, N, N, D)
    d2 = jnp.sum(diff * diff, axis=-1)                   # (B, N, N)
    kmat = jnp.exp(-0.5 * inv_sigma2 * d2)               # (B, N, N)
    grad_mom = jnp.einsum("bij,bjd->bid", kmat, p)       # dH/dp
    w = jnp.einsum("bid,bjd->bij", p, p) * kmat
    neg_grad_control = inv_sigma2 * jnp.einsum("bij,bijd->bid", w, diff)
    return neg_grad_control, grad_mom


if __name__ == "__main__":
    key = jax.random.PRNGKey(0)
    keys = jax.random.split(key, 4)

    def _check(B, N, D, k1, k2):
        mom = jax.random.normal(k1, (B, N, D), dtype=jnp.float32) * 0.05
        cp = jax.random.normal(k2, (B, N, D), dtype=jnp.float32) * 0.5

        pdot, qdot = lddmm_hamilton_forward(mom, cp, sigma=0.1)
        jax.block_until_ready((pdot, qdot))

        ref_pdot, ref_qdot = _reference(mom, cp, sigma=0.1)
        assert pdot.shape == (B, N, D) and qdot.shape == (B, N, D)
        # Tolerance accounts for bf16 MXU operands (f32 accumulation); the
        # diagonal term is cancelled exactly in-kernel.
        assert jnp.allclose(pdot, ref_pdot, atol=2e-3, rtol=1e-2)
        assert jnp.allclose(qdot, ref_qdot, atol=2e-3, rtol=1e-2)

    _check(2, 128, 3, keys[0], keys[1])   # canonical small shape
    _check(3, 100, 3, keys[2], keys[3])   # exercises the N-padding path

    print("KERNEL_OK")
</pallas_src>

<mosaic_0001>
module attributes {stable_mosaic.version = 11 : i64} {
  func.func @_lddmm_kernel(%arg0: i32, %arg1: i32, %arg2: i32, %arg3: memref<1x3x128xf32, #tpu.memory_space<vmem>>, %arg4: memref<1x3x128xf32, #tpu.memory_space<vmem>>, %arg5: memref<1x3x128xf32, #tpu.memory_space<vmem>>, %arg6: memref<1x3x128xf32, #tpu.memory_space<vmem>>, %arg7: memref<1x3x128xf32, #tpu.memory_space<vmem>>, %arg8: memref<1x3x128xf32, #tpu.memory_space<vmem>>, %arg9: memref<1x12x128xf32, #tpu.memory_space<vmem>>) attributes {dimension_semantics = [#tpu.dimension_semantics<parallel>, #tpu.dimension_semantics<parallel>, #tpu.dimension_semantics<arbitrary>], iteration_bounds = array<i64: 2, 1, 1>, scalar_prefetch = 0 : i64, scratch_operands = 1 : i64, tpu.core_type = #tpu.core_type<tc>, window_params = [{transform_indices = @transform_0, window_bounds = array<i64: 1, 3, 128>}, {transform_indices = @transform_1, window_bounds = array<i64: 1, 3, 128>}, {transform_indices = @transform_2, window_bounds = array<i64: 1, 3, 128>}, {transform_indices = @transform_3, window_bounds = array<i64: 1, 3, 128>}, {transform_indices = @transform_4, window_bounds = array<i64: 1, 3, 128>}, {transform_indices = @transform_5, window_bounds = array<i64: 1, 3, 128>}]} {
    %c0_i32 = arith.constant 0 : i32
    %0 = arith.cmpi eq, %arg2, %c0_i32 : i32
    %1 = arith.extui %0 : i1 to i32
    %c0_i32_0 = arith.constant 0 : i32
    %2 = arith.cmpi ne, %1, %c0_i32_0 : i32
    scf.if %2 {
      %cst_20 = arith.constant 0.000000e+00 : f32
      %64 = vector.broadcast %cst_20 : f32 to vector<1x12x128xf32>
      %c0_21 = arith.constant 0 : index
      %c0_22 = arith.constant 0 : index
      %c0_23 = arith.constant 0 : index
      %65 = vector.load %arg9[%c0_21, %c0_22, %c0_23] : memref<1x12x128xf32, #tpu.memory_space<vmem>>, vector<1x12x128xf32>
      tpu.vector_store %arg9[%c0_21, %c0_22, %c0_23], %64 {strides = array<i32>} : memref<1x12x128xf32, #tpu.memory_space<vmem>>, vector<1x12x128xf32>,
    } else {
    }
    %c0 = arith.constant 0 : index
    %c0_1 = arith.constant 0 : index
    %c0_2 = arith.constant 0 : index
    %3 = vector.load %arg4[%c0, %c0_1, %c0_2] : memref<1x3x128xf32, #tpu.memory_space<vmem>>, vector<1x3x128xf32>
    %c0_3 = arith.constant 0 : index
    %c0_4 = arith.constant 0 : index
    %c0_5 = arith.constant 0 : index
    %4 = vector.load %arg6[%c0_3, %c0_4, %c0_5] : memref<1x3x128xf32, #tpu.memory_space<vmem>>, vector<1x3x128xf32>
    %c0_6 = arith.constant 0 : index
    %c0_7 = arith.constant 0 : index
    %c0_8 = arith.constant 0 : index
    %5 = vector.load %arg5[%c0_6, %c0_7, %c0_8] : memref<1x3x128xf32, #tpu.memory_space<vmem>>, vector<1x3x128xf32>
    %cst = arith.constant 7.07106781 : f32
    %6 = vector.broadcast %cst : f32 to vector<1x3x128xf32>
    %7 = arith.mulf %3, %6 : vector<1x3x128xf32>
    %cst_9 = arith.constant 7.07106781 : f32
    %8 = vector.broadcast %cst_9 : f32 to vector<1x3x128xf32>
    %9 = arith.mulf %4, %8 : vector<1x3x128xf32>
    %10 = vector.extract_strided_slice %9 {offsets = [0, 0, 0], sizes = [1, 1, 128], strides = [1, 1, 1]} : vector<1x3x128xf32> to vector<1x1x128xf32>
    %11 = vector.shape_cast %10 : vector<1x1x128xf32> to vector<1x128xf32>
    %12 = vector.shape_cast %11 : vector<1x128xf32> to vector<1x128x1xf32>
    %13 = vector.extract_strided_slice %7 {offsets = [0, 0, 0], sizes = [1, 1, 128], strides = [1, 1, 1]} : vector<1x3x128xf32> to vector<1x1x128xf32>
    %14 = vector.shape_cast %13 : vector<1x1x128xf32> to vector<1x128xf32>
    %15 = vector.shape_cast %14 : vector<1x128xf32> to vector<1x1x128xf32>
    %16 = vector.broadcast %12 : vector<1x128x1xf32> to vector<1x128x128xf32>
    %17 = vector.broadcast %15 : vector<1x1x128xf32> to vector<1x128x128xf32>
    %18 = arith.subf %16, %17 : vector<1x128x128xf32>
    %19 = arith.mulf %18, %18 : vector<1x128x128xf32>
    %20 = vector.extract_strided_slice %9 {offsets = [0, 1, 0], sizes = [1, 1, 128], strides = [1, 1, 1]} : vector<1x3x128xf32> to vector<1x1x128xf32>
    %21 = vector.shape_cast %20 : vector<1x1x128xf32> to vector<1x128xf32>
    %22 = vector.shape_cast %21 : vector<1x128xf32> to vector<1x128x1xf32>
    %23 = vector.extract_strided_slice %7 {offsets = [0, 1, 0], sizes = [1, 1, 128], strides = [1, 1, 1]} : vector<1x3x128xf32> to vector<1x1x128xf32>
    %24 = vector.shape_cast %23 : vector<1x1x128xf32> to vector<1x128xf32>
    %25 = vector.shape_cast %24 : vector<1x128xf32> to vector<1x1x128xf32>
    %26 = vector.broadcast %22 : vector<1x128x1xf32> to vector<1x128x128xf32>
    %27 = vector.broadcast %25 : vector<1x1x128xf32> to vector<1x128x128xf32>
    %28 = arith.subf %26, %27 : vector<1x128x128xf32>
    %29 = arith.mulf %28, %28 : vector<1x128x128xf32>
    %30 = arith.addf %19, %29 : vector<1x128x128xf32>
    %31 = vector.extract_strided_slice %9 {offsets = [0, 2, 0], sizes = [1, 1, 128], strides = [1, 1, 1]} : vector<1x3x128xf32> to vector<1x1x128xf32>
    %32 = vector.shape_cast %31 : vector<1x1x128xf32> to vector<1x128xf32>
    %33 = vector.shape_cast %32 : vector<1x128xf32> to vector<1x128x1xf32>
    %34 = vector.extract_strided_slice %7 {offsets = [0, 2, 0], sizes = [1, 1, 128], strides = [1, 1, 1]} : vector<1x3x128xf32> to vector<1x1x128xf32>
    %35 = vector.shape_cast %34 : vector<1x1x128xf32> to vector<1x128xf32>
    %36 = vector.shape_cast %35 : vector<1x128xf32> to vector<1x1x128xf32>
    %37 = vector.broadcast %33 : vector<1x128x1xf32> to vector<1x128x128xf32>
    %38 = vector.broadcast %36 : vector<1x1x128xf32> to vector<1x128x128xf32>
    %39 = arith.subf %37, %38 : vector<1x128x128xf32>
    %40 = arith.mulf %39, %39 : vector<1x128x128xf32>
    %41 = arith.addf %30, %40 : vector<1x128x128xf32>
    %cst_10 = arith.constant 0.000000e+00 : f32
    %42 = vector.broadcast %cst_10 : f32 to vector<1x128x128xf32>
    %43 = arith.subf %42, %41 : vector<1x128x128xf32>
    %44 = math.exp %43 : vector<1x128x128xf32>
    %45 = arith.truncf %44 : vector<1x128x128xf32> to vector<1x128x128xbf16>
    %46 = vector.extract_strided_slice %5 {offsets = [0, 0, 0], sizes = [1, 1, 128], strides = [1, 1, 1]} : vector<1x3x128xf32> to vector<1x1x128xf32>
    %47 = vector.broadcast %46 : vector<1x1x128xf32> to vector<1x3x128xf32>
    %48 = arith.mulf %47, %4 : vector<1x3x128xf32>
    %49 = vector.extract_strided_slice %5 {offsets = [0, 1, 0], sizes = [1, 1, 128], strides = [1, 1, 1]} : vector<1x3x128xf32> to vector<1x1x128xf32>
    %50 = vector.broadcast %49 : vector<1x1x128xf32> to vector<1x3x128xf32>
    %51 = arith.mulf %50, %4 : vector<1x3x128xf32>
    %52 = vector.extract_strided_slice %5 {offsets = [0, 2, 0], sizes = [1, 1, 128], strides = [1, 1, 1]} : vector<1x3x128xf32> to vector<1x1x128xf32>
    %53 = vector.broadcast %52 : vector<1x1x128xf32> to vector<1x3x128xf32>
    %54 = arith.mulf %53, %4 : vector<1x3x128xf32>
    %55 = tpu.concatenate %5, %48, %51, %54 in 1 : vector<1x3x128xf32>, vector<1x3x128xf32>, vector<1x3x128xf32>, vector<1x3x128xf32> -> vector<1x12x128xf32>
    %56 = arith.truncf %55 : vector<1x12x128xf32> to vector<1x12x128xbf16>
    %c0_11 = arith.constant 0 : index
    %c0_12 = arith.constant 0 : index
    %c0_13 = arith.constant 0 : index
    %57 = vector.load %arg9[%c0_11, %c0_12, %c0_13] : memref<1x12x128xf32, #tpu.memory_space<vmem>>, vector<1x12x128xf32>
    "tpu.trace_start"() <{level = 10 : i32, message = "brj,bji->bri"}> : () -> ()
    %cst_14 = arith.constant dense<0.000000e+00> : vector<1x12x128xf32>
    %58 = tpu.matmul %56, %45, %cst_14 {dimension_numbers = #tpu.dot_dimension_numbers<[2], [1], [1], [2], [0, 0, 0, 1, 1, 2], [0], [0]>} : vector<1x12x128xbf16>, vector<1x128x128xbf16>, vector<1x12x128xf32> -> vector<1x12x128xf32>
    "tpu.trace_stop"() : () -> ()
    %59 = arith.addf %57, %58 : vector<1x12x128xf32>
    %c0_15 = arith.constant 0 : index
    %c0_16 = arith.constant 0 : index
    %c0_17 = arith.constant 0 : index
    %60 = vector.load %arg9[%c0_15, %c0_16, %c0_17] : memref<1x12x128xf32, #tpu.memory_space<vmem>>, vector<1x12x128xf32>
    tpu.vector_store %arg9[%c0_15, %c0_16, %c0_17], %59 {strides = array<i32>} : memref<1x12x128xf32, #tpu.memory_space<vmem>>, vector<1x12x128xf32>,
    %c0_i32_18 = arith.constant 0 : i32
    %61 = arith.cmpi eq, %arg2, %c0_i32_18 : i32
    %62 = arith.extui %61 : i1 to i32
    %c0_i32_19 = arith.constant 0 : i32
    %63 = arith.cmpi ne, %62, %c0_i32_19 : i32
    scf.if %63 {
      %c0_20 = arith.constant 0 : index
      %c0_21 = arith.constant 0 : index
      %c0_22 = arith.constant 0 : index
      %64 = vector.load %arg9[%c0_20, %c0_21, %c0_22] : memref<1x12x128xf32, #tpu.memory_space<vmem>>, vector<1x12x128xf32>
      %c0_23 = arith.constant 0 : index
      %c0_24 = arith.constant 0 : index
      %c0_25 = arith.constant 0 : index
      %65 = vector.load %arg3[%c0_23, %c0_24, %c0_25] : memref<1x3x128xf32, #tpu.memory_space<vmem>>, vector<1x3x128xf32>
      %66 = vector.extract_strided_slice %64 {offsets = [0, 0, 0], sizes = [1, 3, 128], strides = [1, 1, 1]} : vector<1x12x128xf32> to vector<1x3x128xf32>
      %c0_26 = arith.constant 0 : index
      %c0_27 = arith.constant 0 : index
      %c0_28 = arith.constant 0 : index
      %67 = vector.load %arg8[%c0_26, %c0_27, %c0_28] : memref<1x3x128xf32, #tpu.memory_space<vmem>>, vector<1x3x128xf32>
      tpu.vector_store %arg8[%c0_26, %c0_27, %c0_28], %66 {strides = array<i32>} : memref<1x3x128xf32, #tpu.memory_space<vmem>>, vector<1x3x128xf32>,
      %68 = vector.extract_strided_slice %65 {offsets = [0, 0, 0], sizes = [1, 1, 128], strides = [1, 1, 1]} : vector<1x3x128xf32> to vector<1x1x128xf32>
      %69 = vector.extract_strided_slice %64 {offsets = [0, 0, 0], sizes = [1, 1, 128], strides = [1, 1, 1]} : vector<1x12x128xf32> to vector<1x1x128xf32>
      %70 = arith.truncf %68 : vector<1x1x128xf32> to vector<1x1x128xbf16>
      %71 = arith.extf %70 : vector<1x1x128xbf16> to vector<1x1x128xf32>
      %72 = arith.subf %69, %71 : vector<1x1x128xf32>
      %73 = arith.mulf %68, %72 : vector<1x1x128xf32>
      %74 = vector.extract_strided_slice %64 {offsets = [0, 3, 0], sizes = [1, 3, 128], strides = [1, 1, 1]} : vector<1x12x128xf32> to vector<1x3x128xf32>
      %75 = vector.broadcast %68 : vector<1x1x128xf32> to vector<1x3x128xf32>
      %76 = arith.mulf %75, %3 : vector<1x3x128xf32>
      %77 = arith.truncf %76 : vector<1x3x128xf32> to vector<1x3x128xbf16>
      %78 = arith.extf %77 : vector<1x3x128xbf16> to vector<1x3x128xf32>
      %79 = arith.subf %74, %78 : vector<1x3x128xf32>
      %80 = vector.broadcast %68 : vector<1x1x128xf32> to vector<1x3x128xf32>
      %81 = arith.mulf %80, %79 : vector<1x3x128xf32>
      %82 = vector.extract_strided_slice %65 {offsets = [0, 1, 0], sizes = [1, 1, 128], strides = [1, 1, 1]} : vector<1x3x128xf32> to vector<1x1x128xf32>
      %83 = vector.extract_strided_slice %64 {offsets = [0, 1, 0], sizes = [1, 1, 128], strides = [1, 1, 1]} : vector<1x12x128xf32> to vector<1x1x128xf32>
      %84 = arith.truncf %82 : vector<1x1x128xf32> to vector<1x1x128xbf16>
      %85 = arith.extf %84 : vector<1x1x128xbf16> to vector<1x1x128xf32>
      %86 = arith.subf %83, %85 : vector<1x1x128xf32>
      %87 = arith.mulf %82, %86 : vector<1x1x128xf32>
      %88 = arith.addf %73, %87 : vector<1x1x128xf32>
      %89 = vector.extract_strided_slice %64 {offsets = [0, 6, 0], sizes = [1, 3, 128], strides = [1, 1, 1]} : vector<1x12x128xf32> to vector<1x3x128xf32>
      %90 = vector.broadcast %82 : vector<1x1x128xf32> to vector<1x3x128xf32>
      %91 = arith.mulf %90, %3 : vector<1x3x128xf32>
      %92 = arith.truncf %91 : vector<1x3x128xf32> to vector<1x3x128xbf16>
      %93 = arith.extf %92 : vector<1x3x128xbf16> to vector<1x3x128xf32>
      %94 = arith.subf %89, %93 : vector<1x3x128xf32>
      %95 = vector.broadcast %82 : vector<1x1x128xf32> to vector<1x3x128xf32>
      %96 = arith.mulf %95, %94 : vector<1x3x128xf32>
      %97 = arith.addf %81, %96 : vector<1x3x128xf32>
      %98 = vector.extract_strided_slice %65 {offsets = [0, 2, 0], sizes = [1, 1, 128], strides = [1, 1, 1]} : vector<1x3x128xf32> to vector<1x1x128xf32>
      %99 = vector.extract_strided_slice %64 {offsets = [0, 2, 0], sizes = [1, 1, 128], strides = [1, 1, 1]} : vector<1x12x128xf32> to vector<1x1x128xf32>
      %100 = arith.truncf %98 : vector<1x1x128xf32> to vector<1x1x128xbf16>
      %101 = arith.extf %100 : vector<1x1x128xbf16> to vector<1x1x128xf32>
      %102 = arith.subf %99, %101 : vector<1x1x128xf32>
      %103 = arith.mulf %98, %102 : vector<1x1x128xf32>
      %104 = arith.addf %88, %103 : vector<1x1x128xf32>
      %105 = vector.extract_strided_slice %64 {offsets = [0, 9, 0], sizes = [1, 3, 128], strides = [1, 1, 1]} : vector<1x12x128xf32> to vector<1x3x128xf32>
      %106 = vector.broadcast %98 : vector<1x1x128xf32> to vector<1x3x128xf32>
      %107 = arith.mulf %106, %3 : vector<1x3x128xf32>
      %108 = arith.truncf %107 : vector<1x3x128xf32> to vector<1x3x128xbf16>
      %109 = arith.extf %108 : vector<1x3x128xbf16> to vector<1x3x128xf32>
      %110 = arith.subf %105, %109 : vector<1x3x128xf32>
      %111 = vector.broadcast %98 : vector<1x1x128xf32> to vector<1x3x128xf32>
      %112 = arith.mulf %111, %110 : vector<1x3x128xf32>
      %113 = arith.addf %97, %112 : vector<1x3x128xf32>
      %114 = vector.broadcast %104 : vector<1x1x128xf32> to vector<1x3x128xf32>
      %115 = arith.mulf %114, %3 : vector<1x3x128xf32>
      %116 = arith.subf %115, %113 : vector<1x3x128xf32>
      %cst_29 = arith.constant 1.000000e+02 : f32
      %117 = vector.broadcast %cst_29 : f32 to vector<1x3x128xf32>
      %118 = arith.mulf %117, %116 : vector<1x3x128xf32>
      %c0_30 = arith.constant 0 : index
      %c0_31 = arith.constant 0 : index
      %c0_32 = arith.constant 0 : index
      %119 = vector.load %arg7[%c0_30, %c0_31, %c0_32] : memref<1x3x128xf32, #tpu.memory_space<vmem>>, vector<1x3x128xf32>
      tpu.vector_store %arg7[%c0_30, %c0_31, %c0_32], %118 {strides = array<i32>} : memref<1x3x128xf32, #tpu.memory_space<vmem>>, vector<1x3x128xf32>,
    } else {
    }
    return
  }
  func.func @transform_0(%arg0: i32, %arg1: i32, %arg2: i32) -> (i32, i32, i32) {
    %c0_i32 = arith.constant 0 : i32
    %c0_i32_0 = arith.constant 0 : i32
    return %arg0, %c0_i32, %arg1 : i32, i32, i32
  }
  func.func @transform_1(%arg0: i32, %arg1: i32, %arg2: i32) -> (i32, i32, i32) {
    %c0_i32 = arith.constant 0 : i32
    %c0_i32_0 = arith.constant 0 : i32
    return %arg0, %c0_i32, %arg1 : i32, i32, i32
  }
  func.func @transform_2(%arg0: i32, %arg1: i32, %arg2: i32) -> (i32, i32, i32) {
    %c0_i32 = arith.constant 0 : i32
    %c0_i32_0 = arith.constant 0 : i32
    return %arg0, %c0_i32, %arg2 : i32, i32, i32
  }
  func.func @transform_3(%arg0: i32, %arg1: i32, %arg2: i32) -> (i32, i32, i32) {
    %c0_i32 = arith.constant 0 : i32
    %c0_i32_0 = arith.constant 0 : i32
    return %arg0, %c0_i32, %arg2 : i32, i32, i32
  }
  func.func @transform_4(%arg0: i32, %arg1: i32, %arg2: i32) -> (i32, i32, i32) {
    %c0_i32 = arith.constant 0 : i32
    %c0_i32_0 = arith.constant 0 : i32
    return %arg0, %c0_i32, %arg1 : i32, i32, i32
  }
  func.func @transform_5(%arg0: i32, %arg1: i32, %arg2: i32) -> (i32, i32, i32) {
    %c0_i32 = arith.constant 0 : i32
    %c0_i32_0 = arith.constant 0 : i32
    return %arg0, %c0_i32, %arg1 : i32, i32, i32
  }
}

</mosaic_0001>

<bundles_post_ra>
// kernel: tpu_custom_call.1
= control target key start
LH: loop header
LB: loop body
LE: loop exit
PB: predicated region body
PF: predicated region fallthrough
CT: control target
= control target key end

     0   :  { %s1246_s18 = smov 0   ;;  %s1248_s19 = smov 0   ;;  %s1395_s0 = inlined_call_operand.vmem [shape: f32[2,3,128], index: 0, kind: input, shape index: {}]   ;;  %s1396_s1 = inlined_call_operand.vmem [shape: f32[2,3,128], index: 1, kind: input, shape index: {}]   ;;  %s1397_s2 = inlined_call_operand.vmem [shape: f32[2,3,128], index: 2, kind: input, shape index: {}]   ;;  %s1398_s3 = inlined_call_operand.vmem [shape: f32[2,3,128], index: 3, kind: input, shape index: {}]   ;;  %s1399_s4 = inlined_call_operand.vmem [shape: f32[2,3,128], index: 4, kind: output, shape index: {0}]   ;;  %s1400_s5 = inlined_call_operand.vmem [shape: f32[2,3,128], index: 5, kind: output, shape index: {1}]  }
   0x1   :  { %s1250_s20 = smov 0  }
   0x2 LB: > { %s35_s21 = sadd.s32 1, %s1208_s19  ;;  %p1094_p0 = scmp.ge.s32.totalorder %s1212_s20, 1  ;;  %s1212_s20 = sphi %s1250_s20, %s16_s20   ;;  %s1208_s19 = sphi %s1248_s19, %s1402_s19   ;;  %s1204_s18 = sphi %s1246_s18, %s1401_s18  }
   0x3   : > { %p37_p1 = scmp.ge.s32.totalorder %s35_s21, 2  ;;  %p259_p2 = scmp.lt.s32.totalorder %s1212_s20, 3 }
   0x5   : > { %s1404_s21 = smov (%p37_p1, %s35_s21), 0  ;;  %p260_p3 = pnand %p1094_p0, %p259_p2 }
   0x6   : > { %p319_p4 = scmp.lt.s32.totalorder (!%p260_p3), %s1204_s18, 1 }
   0x7   : > { %263 = sbr.rel (%p260_p3) target bundleno = 482 (0x1e2), region = 36 }
   0xc   : > { %v373_v0 = vlaneseq  ;;  %s1406_s18 = smov (!%p319_p4, %s1204_s18), 1  ;;  %v1214_v10 = vmov 0.0   ;;  %vm1215_vm0 = vmmov 0   ;;  %vm794_vm1 = vcmask 1042432  }
   0xd   : > { %s1264_s22 = sshll.u32 %s1406_s18, 2  ;;  %1112 = vmatprep.subr.bf16.mxu0 %v1214_v10  ;;  %367 = vst [vmem:[#allocation2 + $0x8] sm:$0xf] %v1214_v10  ;;  %1128 = vmatprep.mubr.msk.bf16.mxu0 %vm1215_vm0, %v1214_v10  ;;  %vm796_vm2 = vcmask 1045504   ;;  %vm798_vm3 = vcmask 1040384   ;;  %vm891_vm4 = vcmask 1044480  }
   0xe   : > { %v374_v1 = vshrl.u32 %v373_v0, 7  ;;  %s346_s25 = scalar_lea.vmem %s1398_s3, %s1264_s22  ;;  %s332_s28 = scalar_lea.vmem %s1396_s1, %s1264_s22 }
   0xf   : > { %v1274_v4 = vld [vmem:[%s346_s25] sm:$0x7]  ;;  %s339_s6 = scalar_lea.vmem %s1397_s2, %s1264_s22  ;;  %s325_s9 = scalar_lea.vmem %s1395_s0, %s1264_s22 }
  0x10   : > { %v1270_v2 = vsub.s32 1, %v374_v1  ;;  %v1272_v3 = vsub.s32 0, %v374_v1  ;;  %v372_v5 = vmul.f32 7.071068, %v1274_v4  ;;  %v1279_v8 = vsub.s32 2, %v374_v1  ;;  %s360_s12 = scalar_lea.vmem %s1400_s5, %s1264_s22  ;;  %s353_s15 = scalar_lea.vmem %s1399_s4, %s1264_s22 }
  0x11   : > { %v1288_v11 = vld [vmem:[%s332_s28] sm:$0x7] }
  0x12   : > { %v479_v6 = vrot.slane %v372_v5, %v1270_v2  ;;  %v376_v7 = vrot.slane %v372_v5, %v1272_v3  ;;  %v598_v9 = vrot.slane %v372_v5, %v1279_v8  ;;  %v371_v12 = vmul.f32 7.071068, %v1288_v11 }
  0x14   : > { %537 = vbcast.lane.b32.xlu1 %v479_v6, 368  ;;  %434 = vbcast.lane.b32.xlu0 %v376_v7, 368  ;;  %v1293_v13 = vrot.slane %v371_v12, %v1270_v2  ;;  %v1296_v14 = vrot.slane %v371_v12, %v1272_v3  ;;  %v1303_v23 = vrot.slane %v371_v12, %v1279_v8 }
  0x18   : > { %541 = vbcast.lane.b32.xlu1 %v479_v6, 376  ;;  %438 = vbcast.lane.b32.xlu0 %v376_v7, 376 }
  0x1c   : > { %660 = vbcast.lane.b32.xlu1 %v598_v9, 376  ;;  %656 = vbcast.lane.b32.xlu0 %v598_v9, 368 }
  0x20   : > { %430 = vbcast.lane.b32.xlu1 %v376_v7, 360  ;;  %426 = vbcast.lane.b32.xlu0 %v376_v7, 352 }
  0x24   : > { %533 = vbcast.lane.b32.xlu1 %v479_v6, 360  ;;  %529 = vbcast.lane.b32.xlu0 %v479_v6, 352 }
  0x28   : > { %652 = vbcast.lane.b32.xlu1 %v598_v9, 360  ;;  %648 = vbcast.lane.b32.xlu0 %v598_v9, 352 }
  0x2c   : > { %422 = vbcast.lane.b32.xlu1 %v376_v7, 344  ;;  %418 = vbcast.lane.b32.xlu0 %v376_v7, 336 }
  0x30   : > { %525 = vbcast.lane.b32.xlu1 %v479_v6, 344  ;;  %521 = vbcast.lane.b32.xlu0 %v479_v6, 336 }
  0x34   : > { %644 = vbcast.lane.b32.xlu1 %v598_v9, 344  ;;  %640 = vbcast.lane.b32.xlu0 %v598_v9, 336 }
  0x38   : > { %414 = vbcast.lane.b32.xlu1 %v376_v7, 328  ;;  %410 = vbcast.lane.b32.xlu0 %v376_v7, 320 }
  0x3c   : > { %517 = vbcast.lane.b32.xlu1 %v479_v6, 328  ;;  %513 = vbcast.lane.b32.xlu0 %v479_v6, 320 }
  0x40   : > { %636 = vbcast.lane.b32.xlu1 %v598_v9, 328  ;;  %632 = vbcast.lane.b32.xlu0 %v598_v9, 320 }
  0x44   : > { %406 = vbcast.lane.b32.xlu1 %v376_v7, 312  ;;  %402 = vbcast.lane.b32.xlu0 %v376_v7, 304 }
  0x48   : > { %509 = vbcast.lane.b32.xlu1 %v479_v6, 312  ;;  %505 = vbcast.lane.b32.xlu0 %v479_v6, 304 }
  0x4c   : > { %628 = vbcast.lane.b32.xlu1 %v598_v9, 312  ;;  %624 = vbcast.lane.b32.xlu0 %v598_v9, 304 }
  0x50   : > { %398 = vbcast.lane.b32.xlu1 %v376_v7, 296  ;;  %394 = vbcast.lane.b32.xlu0 %v376_v7, 288 }
  0x54   : > { %501 = vbcast.lane.b32.xlu1 %v479_v6, 296  ;;  %497 = vbcast.lane.b32.xlu0 %v479_v6, 288 }
  0x58   : > { %620 = vbcast.lane.b32.xlu1 %v598_v9, 296  ;;  %616 = vbcast.lane.b32.xlu0 %v598_v9, 288 }
  0x5c   : > { %390 = vbcast.lane.b32.xlu1 %v376_v7, 280  ;;  %386 = vbcast.lane.b32.xlu0 %v376_v7, 272 }
  0x60   : > { %493 = vbcast.lane.b32.xlu1 %v479_v6, 280  ;;  %489 = vbcast.lane.b32.xlu0 %v479_v6, 272 }
  0x64   : > { %612 = vbcast.lane.b32.xlu1 %v598_v9, 280  ;;  %608 = vbcast.lane.b32.xlu0 %v598_v9, 272 }
  0x68   : > { %382 = vbcast.lane.b32.xlu1 %v376_v7, 264  ;;  %378 = vbcast.lane.b32.xlu0 %v376_v7, 256 }
  0x6c   : > { %485 = vbcast.lane.b32.xlu1 %v479_v6, 264  ;;  %481 = vbcast.lane.b32.xlu0 %v479_v6, 256 }
  0x70   : > { %604 = vbcast.lane.b32.xlu1 %v598_v9, 264  ;;  %600 = vbcast.lane.b32.xlu0 %v598_v9, 256 }
  0x86   : > { %v538_v15 = vpop.permute.xlu1 %537  ;;  %v435_v16 = vpop.permute.xlu0 %434 }
  0x87   : > { %v561_v17 = vsub.f32 %v538_v15, %v1293_v13  ;;  %v458_v18 = vsub.f32 %v435_v16, %v1296_v14 }
  0x89   : > { %v577_v24 = vmul.f32 %v561_v17, %v561_v17  ;;  %v474_v25 = vmul.f32 %v458_v18, %v458_v18 }
  0x8a   : > { %v542_v19 = vpop.permute.xlu1 %541  ;;  %v439_v20 = vpop.permute.xlu0 %438 }
  0x8b   : > { %v562_v21 = vsub.f32 %v542_v19, %v1293_v13  ;;  %v459_v22 = vsub.f32 %v439_v20, %v1296_v14  ;;  %v593_v32 = vadd.f32 %v577_v24, %v474_v25 }
  0x8d   : > { %v578_v26 = vmul.f32 %v562_v21, %v562_v21  ;;  %v475_v27 = vmul.f32 %v459_v22, %v459_v22 }
  0x8e   : > { %v661_v28 = vpop.permute.xlu1 %660  ;;  %v657_v29 = vpop.permute.xlu0 %656 }
  0x8f   : > { %v681_v30 = vsub.f32 %v661_v28, %v1303_v23  ;;  %v680_v31 = vsub.f32 %v657_v29, %v1303_v23  ;;  %v594_v33 = vadd.f32 %v578_v26, %v475_v27 }
  0x91   : > { %v697_v34 = vmul.f32 %v681_v30, %v681_v30  ;;  %v696_v35 = vmul.f32 %v680_v31, %v680_v31 }
  0x92   : > { %v431_v36 = vpop.permute.xlu1 %430  ;;  %v427_v37 = vpop.permute.xlu0 %426 }
  0x93   : > { %v713_v38 = vadd.f32 %v697_v34, %v594_v33  ;;  %v712_v39 = vadd.f32 %v696_v35, %v593_v32  ;;  %v457_v42 = vsub.f32 %v431_v36, %v1296_v14  ;;  %v456_v43 = vsub.f32 %v427_v37, %v1296_v14 }
  0x95   : > { %v729_v40 = vsub.f32 0.0, %v713_v38  ;;  %v728_v41 = vsub.f32 0.0, %v712_v39  ;;  %v473_v54 = vmul.f32 %v457_v42, %v457_v42  ;;  %v472_v55 = vmul.f32 %v456_v43, %v456_v43 }
  0x96   : > { %v534_v44 = vpop.permute.xlu1 %533  ;;  %v530_v45 = vpop.permute.xlu0 %529 }
  0x97   : > { %v760_v46 = vmul.f32 1.442695, %v729_v40  ;;  %v758_v47 = vmul.f32 1.442695, %v728_v41  ;;  %v560_v48 = vsub.f32 %v534_v44, %v1293_v13  ;;  %v559_v49 = vsub.f32 %v530_v45, %v1293_v13 }
  0x99   : > { %1158 = vpow2.f32 %v760_v46  ;;  %v576_v50 = vmul.f32 %v560_v48, %v560_v48  ;;  %v575_v51 = vmul.f32 %v559_v49, %v559_v49 }
  0x9a   : > { %1160 = vpow2.f32 %v758_v47  ;;  %v653_v52 = vpop.permute.xlu1 %652  ;;  %v649_v53 = vpop.permute.xlu0 %648 }
  0x9b   : > { %v679_v56 = vsub.f32 %v653_v52, %v1303_v23  ;;  %v678_v57 = vsub.f32 %v649_v53, %v1303_v23  ;;  %v592_v58 = vadd.f32 %v576_v50, %v473_v54  ;;  %v591_v59 = vadd.f32 %v575_v51, %v472_v55 }
  0x9d   : > { %v695_v60 = vmul.f32 %v679_v56, %v679_v56  ;;  %v694_v61 = vmul.f32 %v678_v57, %v678_v57 }
  0x9e   : > { %v423_v62 = vpop.permute.xlu1 %422  ;;  %v419_v63 = vpop.permute.xlu0 %418 }
  0x9f   : > { %v711_v0 = vadd.f32 %v695_v60, %v592_v58  ;;  %v710_v1 = vadd.f32 %v694_v61, %v591_v59  ;;  %v455_v7 = vsub.f32 %v423_v62, %v1296_v14  ;;  %v454_v9 = vsub.f32 %v419_v63, %v1296_v14 }
  0xa1   : > { %v727_v5 = vsub.f32 0.0, %v711_v0  ;;  %v726_v6 = vsub.f32 0.0, %v710_v1  ;;  %v471_v27 = vmul.f32 %v455_v7, %v455_v7  ;;  %v470_v28 = vmul.f32 %v454_v9, %v454_v9 }
  0xa2   : > { %v526_v12 = vpop.permute.xlu1 %525  ;;  %v522_v15 = vpop.permute.xlu0 %521 }
  0xa3   : > { %v756_v16 = vmul.f32 1.442695, %v727_v5  ;;  %v754_v17 = vmul.f32 1.442695, %v726_v6  ;;  %v558_v18 = vsub.f32 %v526_v12, %v1293_v13  ;;  %v557_v19 = vsub.f32 %v522_v15, %v1293_v13 }
  0xa5   : > { %1162 = vpow2.f32 %v756_v16  ;;  %v574_v20 = vmul.f32 %v558_v18, %v558_v18  ;;  %v573_v21 = vmul.f32 %v557_v19, %v557_v19 }
  0xa6   : > { %v1159_v22 = vpop.eup %1158  ;;  %1164 = vpow2.f32 %v754_v17  ;;  %v645_v24 = vpop.permute.xlu1 %644 }
  0xa7   : > { %v641_v25 = vpop.permute.xlu0 %640  ;;  %v1161_v26 = vpop.eup %1160  ;;  %v677_v29 = vsub.f32 %v645_v24, %v1303_v23  ;;  %v590_v32 = vadd.f32 %v574_v20, %v471_v27  ;;  %v589_v33 = vadd.f32 %v573_v21, %v470_v28 }
  0xa8   : > { %v676_v30 = vsub.f32 %v641_v25, %v1303_v23  ;;  %v769_v31 = vpack.c.bf16 %v1159_v22, %v1161_v26 }
  0xa9   : > { %v693_v34 = vmul.f32 %v677_v29, %v677_v29 }
  0xaa   : > { %v692_v35 = vmul.f32 %v676_v30, %v676_v30  ;;  %1113 = vmatpush3.bf16.msra.mxu0 %v769_v31  ;;  %v415_v36 = vpop.permute.xlu1 %414 }
  0xab   : > { %v411_v37 = vpop.permute.xlu0 %410  ;;  %v709_v38 = vadd.f32 %v693_v34, %v590_v32  ;;  %1114 = vmatprep.subr.bf16.mxu0 %v1214_v10  ;;  %v453_v42 = vsub.f32 %v415_v36, %v1296_v14 }
  0xac   : > { %v708_v39 = vadd.f32 %v692_v35, %v589_v33  ;;  %v452_v43 = vsub.f32 %v411_v37, %v1296_v14 }
  0xad   : > { %v725_v40 = vsub.f32 0.0, %v709_v38  ;;  %v469_v56 = vmul.f32 %v453_v42, %v453_v42 }
  0xae   : > { %v724_v41 = vsub.f32 0.0, %v708_v39  ;;  %v518_v44 = vpop.permute.xlu1 %517  ;;  %v468_v57 = vmul.f32 %v452_v43, %v452_v43 }
  0xaf   : > { %v514_v45 = vpop.permute.xlu0 %513  ;;  %v752_v46 = vmul.f32 1.442695, %v725_v40  ;;  %v556_v48 = vsub.f32 %v518_v44, %v1293_v13 }
  0xb0   : > { %v750_v47 = vmul.f32 1.442695, %v724_v41  ;;  %v555_v49 = vsub.f32 %v514_v45, %v1293_v13 }
  0xb1   : > { %1166 = vpow2.f32 %v752_v46  ;;  %v572_v50 = vmul.f32 %v556_v48, %v556_v48 }
  0xb2   : > { %v571_v51 = vmul.f32 %v555_v49, %v555_v49  ;;  %v1163_v52 = vpop.eup %1162  ;;  %1168 = vpow2.f32 %v750_v47  ;;  %v637_v53 = vpop.permute.xlu1 %636 }
  0xb3   : > { %v633_v54 = vpop.permute.xlu0 %632  ;;  %v1165_v55 = vpop.eup %1164  ;;  %v675_v58 = vsub.f32 %v637_v53, %v1303_v23  ;;  %v588_v61 = vadd.f32 %v572_v50, %v469_v56 }
  0xb4   : > { %v674_v59 = vsub.f32 %v633_v54, %v1303_v23  ;;  %v768_v60 = vpack.c.bf16 %v1163_v52, %v1165_v55  ;;  %v587_v62 = vadd.f32 %v571_v51, %v468_v57 }
  0xb5   : > { %v691_v63 = vmul.f32 %v675_v58, %v675_v58 }
  0xb6   : > { %v690_v0 = vmul.f32 %v674_v59, %v674_v59  ;;  %1115 = vmatpush3.bf16.msra.mxu0 %v768_v60  ;;  %v407_v1 = vpop.permute.xlu1 %406 }
  0xb7   : > { %v403_v5 = vpop.permute.xlu0 %402  ;;  %v707_v6 = vadd.f32 %v691_v63, %v588_v61  ;;  %1116 = vmatprep.subr.bf16.mxu0 %v1214_v10  ;;  %v451_v15 = vsub.f32 %v407_v1, %v1296_v14 }
  0xb8   : > { %v706_v7 = vadd.f32 %v690_v0, %v587_v62  ;;  %v450_v16 = vsub.f32 %v403_v5, %v1296_v14 }
  0xb9   : > { %v723_v9 = vsub.f32 0.0, %v707_v6  ;;  %v467_v30 = vmul.f32 %v451_v15, %v451_v15 }
  0xba   : > { %v722_v12 = vsub.f32 0.0, %v706_v7  ;;  %v510_v17 = vpop.permute.xlu1 %509  ;;  %v466_v31 = vmul.f32 %v450_v16, %v450_v16 }
  0xbb   : > { %v506_v18 = vpop.permute.xlu0 %505  ;;  %v748_v19 = vmul.f32 1.442695, %v723_v9  ;;  %v554_v21 = vsub.f32 %v510_v17, %v1293_v13 }
  0xbc   : > { %v746_v20 = vmul.f32 1.442695, %v722_v12  ;;  %v553_v22 = vsub.f32 %v506_v18, %v1293_v13 }
  0xbd   : > { %1170 = vpow2.f32 %v748_v19  ;;  %v570_v24 = vmul.f32 %v554_v21, %v554_v21 }
  0xbe   : > { %v569_v25 = vmul.f32 %v553_v22, %v553_v22  ;;  %v1167_v26 = vpop.eup %1166  ;;  %1172 = vpow2.f32 %v746_v20  ;;  %v629_v27 = vpop.permute.xlu1 %628 }
  0xbf   : > { %v625_v28 = vpop.permute.xlu0 %624  ;;  %v1169_v29 = vpop.eup %1168  ;;  %v673_v32 = vsub.f32 %v629_v27, %v1303_v23  ;;  %v586_v35 = vadd.f32 %v570_v24, %v467_v30 }
  0xc0   : > { %v672_v33 = vsub.f32 %v625_v28, %v1303_v23  ;;  %v767_v34 = vpack.c.bf16 %v1167_v26, %v1169_v29  ;;  %v585_v36 = vadd.f32 %v569_v25, %v466_v31 }
  0xc1   : > { %v689_v37 = vmul.f32 %v673_v32, %v673_v32 }
  0xc2   : > { %v688_v38 = vmul.f32 %v672_v33, %v672_v33  ;;  %1117 = vmatpush3.bf16.msra.mxu0 %v767_v34  ;;  %v399_v39 = vpop.permute.xlu1 %398 }
  0xc3   : > { %v395_v40 = vpop.permute.xlu0 %394  ;;  %v705_v41 = vadd.f32 %v689_v37, %v586_v35  ;;  %1118 = vmatprep.subr.bf16.mxu0 %v1214_v10  ;;  %v449_v45 = vsub.f32 %v399_v39, %v1296_v14 }
  0xc4   : > { %v704_v42 = vadd.f32 %v688_v38, %v585_v36  ;;  %v448_v46 = vsub.f32 %v395_v40, %v1296_v14 }
  0xc5   : > { %v721_v43 = vsub.f32 0.0, %v705_v41  ;;  %v465_v59 = vmul.f32 %v449_v45, %v449_v45 }
  0xc6   : > { %v720_v44 = vsub.f32 0.0, %v704_v42  ;;  %v502_v47 = vpop.permute.xlu1 %501  ;;  %v464_v60 = vmul.f32 %v448_v46, %v448_v46 }
  0xc7   : > { %v498_v48 = vpop.permute.xlu0 %497  ;;  %v744_v49 = vmul.f32 1.442695, %v721_v43  ;;  %v552_v51 = vsub.f32 %v502_v47, %v1293_v13 }
  0xc8   : > { %v742_v50 = vmul.f32 1.442695, %v720_v44  ;;  %v551_v52 = vsub.f32 %v498_v48, %v1293_v13 }
  0xc9   : > { %1174 = vpow2.f32 %v744_v49  ;;  %v568_v53 = vmul.f32 %v552_v51, %v552_v51 }
  0xca   : > { %v567_v54 = vmul.f32 %v551_v52, %v551_v52  ;;  %v1171_v55 = vpop.eup %1170  ;;  %1176 = vpow2.f32 %v742_v50  ;;  %v621_v56 = vpop.permute.xlu1 %620 }
  0xcb   : > { %v617_v57 = vpop.permute.xlu0 %616  ;;  %v1173_v58 = vpop.eup %1172  ;;  %v671_v61 = vsub.f32 %v621_v56, %v1303_v23  ;;  %v584_v0 = vadd.f32 %v568_v53, %v465_v59 }
  0xcc   : > { %v670_v62 = vsub.f32 %v617_v57, %v1303_v23  ;;  %v766_v63 = vpack.c.bf16 %v1171_v55, %v1173_v58  ;;  %v583_v1 = vadd.f32 %v567_v54, %v464_v60 }
  0xcd   : > { %v687_v5 = vmul.f32 %v671_v61, %v671_v61 }
  0xce   : > { %v686_v6 = vmul.f32 %v670_v62, %v670_v62  ;;  %1119 = vmatpush3.bf16.msra.mxu0 %v766_v63  ;;  %v391_v7 = vpop.permute.xlu1 %390 }
  0xcf   : > { %v387_v9 = vpop.permute.xlu0 %386  ;;  %v703_v12 = vadd.f32 %v687_v5, %v584_v0  ;;  %1120 = vmatprep.subr.bf16.mxu0 %v1214_v10  ;;  %v447_v18 = vsub.f32 %v391_v7, %v1296_v14 }
  0xd0   : > { %v702_v15 = vadd.f32 %v686_v6, %v583_v1  ;;  %v446_v19 = vsub.f32 %v387_v9, %v1296_v14 }
  0xd1   : > { %v719_v16 = vsub.f32 0.0, %v703_v12  ;;  %v463_v33 = vmul.f32 %v447_v18, %v447_v18 }
  0xd2   : > { %v718_v17 = vsub.f32 0.0, %v702_v15  ;;  %v494_v20 = vpop.permute.xlu1 %493  ;;  %v462_v34 = vmul.f32 %v446_v19, %v446_v19  ;;  %v370_v15 = vld [vmem:[%s339_s6] sm:$0x7] }
  0xd3   : > { %v490_v21 = vpop.permute.xlu0 %489  ;;  %v740_v22 = vmul.f32 1.442695, %v719_v16  ;;  %v550_v25 = vsub.f32 %v494_v20, %v1293_v13 }
  0xd4   : > { %v738_v24 = vmul.f32 1.442695, %v718_v17  ;;  %v549_v26 = vsub.f32 %v490_v21, %v1293_v13  ;;  %v778_v21 = vrot.slane %v370_v15, %v1270_v2 }
  0xd5   : > { %1178 = vpow2.f32 %v740_v22  ;;  %v566_v27 = vmul.f32 %v550_v25, %v550_v25  ;;  %v783_v22 = vrot.slane %v370_v15, %v1279_v8 }
  0xd6   : > { %v565_v28 = vmul.f32 %v549_v26, %v549_v26  ;;  %v1175_v29 = vpop.eup %1174  ;;  %1180 = vpow2.f32 %v738_v24  ;;  %v613_v30 = vpop.permute.xlu1 %612 }
  0xd7   : > { %v609_v31 = vpop.permute.xlu0 %608  ;;  %v1177_v32 = vpop.eup %1176  ;;  %v669_v35 = vsub.f32 %v613_v30, %v1303_v23  ;;  %v582_v38 = vadd.f32 %v566_v27, %v463_v33  ;;  %v779_v27 = vmul.f32 %v778_v21, %v1274_v4 }
  0xd8   : > { %v668_v36 = vsub.f32 %v609_v31, %v1303_v23  ;;  %v765_v37 = vpack.c.bf16 %v1175_v29, %v1177_v32  ;;  %v581_v39 = vadd.f32 %v565_v28, %v462_v34  ;;  %v784_v28 = vmul.f32 %v783_v22, %v1274_v4 }
  0xd9   : > { %v685_v40 = vmul.f32 %v669_v35, %v669_v35  ;;  %v789_v30 = vrot.slane %v779_v27, 2 }
  0xda   : > { %v684_v41 = vmul.f32 %v668_v36, %v668_v36  ;;  %1121 = vmatpush3.bf16.msra.mxu0 %v765_v37  ;;  %v383_v42 = vpop.permute.xlu1 %382  ;;  %v792_v31 = vrot.slane %v784_v28, 7 }
  0xdb   : > { %v379_v43 = vpop.permute.xlu0 %378  ;;  %v701_v44 = vadd.f32 %v685_v40, %v582_v38  ;;  %1122 = vmatprep.subr.bf16.mxu0 %v1214_v10  ;;  %v445_v48 = vsub.f32 %v383_v42, %v1296_v14 }
  0xdc   : > { %v700_v45 = vadd.f32 %v684_v41, %v581_v39  ;;  %v444_v49 = vsub.f32 %v379_v43, %v1296_v14  ;;  %v799_v35 = vsel %vm798_vm3, %v789_v30, %v792_v31 }
  0xdd   : > { %v717_v46 = vsub.f32 0.0, %v701_v44  ;;  %v461_v62 = vmul.f32 %v445_v48, %v445_v48 }
  0xde   : > { %v716_v47 = vsub.f32 0.0, %v700_v45  ;;  %v486_v50 = vpop.permute.xlu1 %485  ;;  %v460_v63 = vmul.f32 %v444_v49, %v444_v49 }
  0xdf   : > { %v482_v51 = vpop.permute.xlu0 %481  ;;  %v736_v52 = vmul.f32 1.442695, %v717_v46  ;;  %v548_v54 = vsub.f32 %v486_v50, %v1293_v13 }
  0xe0   : > { %v734_v53 = vmul.f32 1.442695, %v716_v47  ;;  %v547_v55 = vsub.f32 %v482_v51, %v1293_v13 }
  0xe1   : > { %1182 = vpow2.f32 %v736_v52  ;;  %v564_v56 = vmul.f32 %v548_v54, %v548_v54 }
  0xe2   : > { %v563_v57 = vmul.f32 %v547_v55, %v547_v55  ;;  %v1179_v58 = vpop.eup %1178  ;;  %1184 = vpow2.f32 %v734_v53  ;;  %v605_v59 = vpop.permute.xlu1 %604 }
  0xe3   : > { %v601_v60 = vpop.permute.xlu0 %600  ;;  %v1181_v61 = vpop.eup %1180  ;;  %v667_v14 = vsub.f32 %v605_v59, %v1303_v23  ;;  %v580_v5 = vadd.f32 %v564_v56, %v461_v62 }
  0xe4   : > { %v666_v0 = vsub.f32 %v601_v60, %v1303_v23  ;;  %v764_v1 = vpack.c.bf16 %v1179_v58, %v1181_v61  ;;  %v579_v6 = vadd.f32 %v563_v57, %v460_v63  ;;  %v773_v23 = vrot.slane %v370_v15, %v1272_v3 }
  0xe5   : > { %v683_v7 = vmul.f32 %v667_v14, %v667_v14 }
  0xe6   : > { %v682_v13 = vmul.f32 %v666_v0, %v666_v0  ;;  %1123 = vmatpush3.bf16.msra.mxu0 %v764_v1  ;;  %v774_v25 = vmul.f32 %v773_v23, %v1274_v4  ;;  %v853_v4 = vld [vmem:[%s325_s9] sm:$0x7] }
  0xe7   : > { %v699_v9 = vadd.f32 %v683_v7, %v580_v5  ;;  %1124 = vmatprep.subr.bf16.mxu0 %v1214_v10  ;;  %v855_v39 = vpack.c.bf16 %v853_v4, %v853_v4  ;;  %v903_v41 = vrot.slane %v853_v4, %v1279_v8  ;;  %v862_v42 = vrot.slane %v853_v4, %v1272_v3 }
  0xe8   : > { %v698_v12 = vadd.f32 %v682_v13, %v579_v6  ;;  %v786_v29 = vrot.slane %v774_v25, 5 }
  0xe9   : > { %v715_v16 = vsub.f32 0.0, %v699_v9  ;;  %v856_v43 = vunpack.c.l.bf16 %v855_v39  ;;  %v904_v45 = vmul.f32 %v903_v41, %v1288_v11  ;;  %v863_v47 = vmul.f32 %v862_v42, %v1288_v11 }
  0xea   : > { %v714_v17 = vsub.f32 0.0, %v698_v12  ;;  %v795_v32 = vsel %vm794_vm1, %v370_v15, %v786_v29 }
  0xeb   : > { %v732_v18 = vmul.f32 1.442695, %v715_v16  ;;  %v797_v34 = vsel %vm796_vm2, %v795_v32, %v789_v30  ;;  %v905_v51 = vpack.c.bf16 %v904_v45, %v904_v45  ;;  %v864_v8 = vpack.c.bf16 %v863_v47, %v863_v47 }
  0xec   : > { %v730_v19 = vmul.f32 1.442695, %v714_v17  ;;  %v800_v38 = vpack.c.bf16 %v799_v35, %v797_v34 }
  0xed   : > { %1186 = vpow2.f32 %v732_v18  ;;  %v906_v57 = vunpack.c.l.bf16 %v905_v51  ;;  %v865_v58 = vunpack.c.l.bf16 %v864_v8 }
  0xee   : > { %v1183_v20 = vpop.eup %1182  ;;  %1188 = vpow2.f32 %v730_v19 }
  0xef   : > { %v1185_v24 = vpop.eup %1184  ;;  %v908_v61 = vrot.slane %v906_v57, 7  ;;  %v867_v62 = vrot.slane %v865_v58, 5 }
  0xf0   : > { %v763_v26 = vpack.c.bf16 %v1183_v20, %v1185_v24 }
  0xf2   : > { %1125 = vmatpush3.bf16.msra.mxu0 %v763_v26 }
  0xf3   : > { %1126 = vmatprep.subr.bf16.mxu0 %v1214_v10  ;;  %v878_v10 = vrot.slane %v853_v4, %v1270_v2  ;;  %v802_v2 = vld [vmem:[#allocation2 + $0x8] sm:$0xf] }
  0xf5   : > { %v879_v40 = vmul.f32 %v878_v10, %v1288_v11 }
  0xf7   : > { %v880_v44 = vpack.c.bf16 %v879_v40, %v879_v40 }
  0xf9   : > { %v881_v50 = vunpack.c.l.bf16 %v880_v44 }
  0xfa   : > { %v1187_v33 = vpop.eup %1186 }
  0xfb   : > { %v1189_v36 = vpop.eup %1188  ;;  %v883_v56 = vrot.slane %v881_v50, 2 }
  0xfc   : > { %v762_v37 = vpack.c.bf16 %v1187_v33, %v1189_v36 }
  0xfe   : > { %1127 = vmatpush3.bf16.msra.mxu0 %v762_v37 }
 0x101   : > { %1129 = vmatmul.mubr.bf16.vlgmr.msra.gmra.mxu0 %v800_v38 }
 0x1c1   : > { %v837_v46 = vpop.f32.mrf.mxu0 }
 0x1c2   : > { %854 = vst [vmem:[%s360_s12] sm:$0x7] %v837_v46  ;;  %v857_v49 = vsub.f32 %v837_v46, %v856_v43  ;;  %v885_v60 = vsub.f32 %v837_v46, %v883_v56  ;;  %v869_v6 = vsub.f32 %v837_v46, %v867_v62 }
 0x1c3   : > { %v1130_v48 = vpop.f32.mrf.mxu0 }
 0x1c4   : > { %v858_v54 = vmul.f32 %v857_v49, %v853_v4  ;;  %v887_v1 = vmul.f32 %v885_v60, %v878_v10  ;;  %v870_v17 = vmul.f32 %v869_v6, %v862_v42 }
 0x1c5   : > { %v840_v52 = vpop.f32.mrf.mxu0 }
 0x1c6   : > { %v845_v53 = vadd.f32 %v840_v52, %v802_v2  ;;  %v872_v59 = vrot.slane %v858_v54, 1  ;;  %v897_v7 = vrot.slane %v858_v54, 2  ;;  %v892_v15 = vrot.slane %v887_v1, 3 }
 0x1c7   : > { %v1131_v55 = vpop.f32.mrf.mxu0 }
 0x1c8   : > { %847 = vst [vmem:[#allocation2 + $0x8] sm:$0xf] %v845_v53  ;;  %v874_v63 = vadd.f32 %v872_v59, %v858_v54 }
 0x1ca   : > { %v899_v9 = vadd.f32 %v897_v7, %v874_v63 }
 0x1cc   : > { %v919_v20 = vrot.slane %v899_v9, %v1272_v3 }
 0x1ce   : > { %v920_v22 = vmul.f32 %v919_v20, %v1288_v11 }
 0x1cf   : > { %v852_v14 = vld [vmem:[#allocation2 + $0x8] sm:$0xf] }
 0x1d0   : > { %v886_v0 = vsub.f32 %v852_v14, %v883_v56  ;;  %v910_v5 = vsub.f32 %v852_v14, %v908_v61 }
 0x1d2   : > { %v888_v13 = vmul.f32 %v886_v0, %v878_v10  ;;  %v911_v12 = vmul.f32 %v910_v5, %v903_v41 }
 0x1d4   : > { %v893_v16 = vrot.slane %v888_v13, 3  ;;  %v913_v23 = vrot.slane %v911_v12, 6 }
 0x1d6   : > { %v894_v18 = vsel %vm891_vm4, %v892_v15, %v893_v16 }
 0x1d7   : > { %v896_v19 = vadd.f32 %v894_v18, %v870_v17 }
 0x1d9   : > { %v915_v21 = vadd.f32 %v913_v23, %v896_v19 }
 0x1db   : > { %v922_v24 = vrot.slane %v915_v21, 3 }
 0x1dd   : > { %v924_v25 = vsub.f32 %v920_v22, %v922_v24 }
 0x1df   : > { %v925_v26 = vmul.f32 100.0, %v924_v25 }
 0x1e1   : > { %926 = vst [vmem:[%s353_s15] sm:$0x7] %v925_v26 }
 0x1e2 PF: > { %s16_s20 = sadd.s32 1, %s1212_s20   ;;  %s1401_s18 = smov %s1208_s19 }
 0x1e3   : > { %p13_p5 = scmp.ge.s32.totalorder %s16_s20, 4   ;;  %s1402_s19 = smov %s1404_s21 }
 0x1e5   :  { %15 = sbr.rel (!%p13_p5) target bundleno = 2 (0x2), region = 95 }

</bundles_post_ra>
